<compile_context>
chip_gen: v5e
topology: v5e:2x2
jax: 0.10.0
libtpu: 0.0.40
codegen_flags: <defaults>
</compile_context>

<pallas_src>
import functools
import math

import jax
import jax.numpy as jnp
from jax.experimental import pallas as pl
from jax.experimental.pallas import tpu as pltpu


def _round_up(x, m):
    return ((x + m - 1) // m) * m


def to_fix_point(x, bits):
    """JAX equivalent of the PyTorch to_fix_point (round to fixed-point ints)."""
    # TODO(synk): PyTorch uses int64 (LongTensor); int32 is identical for bits=8
    # and reasonably scaled inputs, and is TPU friendly.
    return jnp.round(x * math.pow(2.0, bits - 1)).astype(jnp.int32)


def _qlinear_kernel(x_ref, wt_ref, b_ref, o_ref, acc_ref):
    """Computes one (tm, tn) output tile; K is the innermost grid axis."""
    k = pl.program_id(2)

    @pl.when(k == 0)
    def _init():
        acc_ref[...] = jnp.zeros_like(acc_ref)

    acc_ref[...] += jnp.dot(x_ref[...], wt_ref[...],
                            preferred_element_type=jnp.float32)

    @pl.when(k == pl.num_programs(2) - 1)
    def _finalize():
        # Scale is already folded into wt; bias is in fixed-point units, added raw.
        o_ref[...] = (acc_ref[...] + b_ref[...]).astype(o_ref.dtype)


def prepare_qlinear(W, b, bits=8, compute_dtype=jnp.bfloat16, tn=None, tk=None):
    """One-time (layer-init) preprocessing, hoisted out of the forward path."""
    OUT, R = W.shape
    weight_fixed = to_fix_point(W, bits)                       # (OUT, R) int32
    if b is None:
        bias_fixed = jnp.zeros((OUT,), dtype=jnp.int32)
    else:
        bias_fixed = to_fix_point(b, bits)                     # (OUT,) int32
    scale = 1.0 / math.pow(2.0, bits - 1)

    # bf16 is lossless for the (scale-folded) weights only while the fixed-point
    # integers fit bf16's 8-bit mantissa; otherwise fall back to exact f32.
    if compute_dtype == jnp.bfloat16 and int(jnp.max(jnp.abs(weight_fixed))) > 256:
        compute_dtype = jnp.float32

    # Lane-dense tiles: N and K tiles are multiples of 128 (capped for VMEM).
    tn = tn if tn is not None else min(512, _round_up(OUT, 128))
    tk = tk if tk is not None else min(512, _round_up(R, 128))
    OUTp = _round_up(OUT, tn)
    Rp = _round_up(R, tk)

    # Fold the power-of-two scale into the weight (exact), transpose so the hot
    # path is x @ W^T, zero-pad to tile multiples, cast to the MXU dtype.
    wt = (weight_fixed.astype(jnp.float32) * scale).T          # (R, OUT)
    wt = jnp.pad(wt, ((0, Rp - R), (0, OUTp - OUT))).astype(compute_dtype)
    bias = jnp.pad(bias_fixed.astype(jnp.float32), (0, OUTp - OUT)).reshape(1, OUTp)

    return dict(wt=wt, bias=bias, out_features=OUT, in_features=R,
                tn=tn, tk=tk, compute_dtype=compute_dtype)


def qlinear_forward(x, params, tm=None):
    """x: (C, R) float; returns (C, out_features) in x.dtype."""
    C, R = x.shape
    assert R == params["in_features"], (R, params["in_features"])
    wt, bias = params["wt"], params["bias"]
    tn, tk = params["tn"], params["tk"]
    compute_dtype = params["compute_dtype"]
    Rp, OUTp = wt.shape
    OUT = params["out_features"]

    tm = tm if tm is not None else min(256, _round_up(C, 8))
    Cp = _round_up(C, tm)

    xp = x
    if (Cp, Rp) != (C, R):
        xp = jnp.pad(xp, ((0, Cp - C), (0, Rp - R)))
    xp = xp.astype(compute_dtype)

    grid = (Cp // tm, OUTp // tn, Rp // tk)

    itemsize = jnp.dtype(compute_dtype).itemsize
    vmem_budget = (2 * tm * tk * itemsize      # x tiles (double-buffered)
                   + 2 * tk * tn * itemsize    # weight tiles
                   + 2 * tn * 4                # bias tiles
                   + 2 * tm * tn * 4           # output tiles
                   + tm * tn * 4)              # f32 accumulator
    vmem_limit = int(min(max(2 * vmem_budget, 16 << 20), 48 << 20))

    out = pl.pallas_call(
        _qlinear_kernel,
        out_shape=jax.ShapeDtypeStruct((Cp, OUTp), jnp.float32),
        grid_spec=pltpu.PrefetchScalarGridSpec(
            num_scalar_prefetch=0,
            grid=grid,
            in_specs=[
                pl.BlockSpec((tm, tk), lambda i, j, k: (i, k)),   # x
                pl.BlockSpec((tk, tn), lambda i, j, k: (k, j)),   # W^T (scaled)
                pl.BlockSpec((1, tn), lambda i, j, k: (0, j)),    # bias_fp
            ],
            out_specs=pl.BlockSpec((tm, tn), lambda i, j, k: (i, j)),
            scratch_shapes=[pltpu.VMEM((tm, tn), jnp.float32)],
        ),
        compiler_params=pltpu.CompilerParams(
            dimension_semantics=("parallel", "parallel", "arbitrary"),
            vmem_limit_bytes=vmem_limit,
        ),
    )(xp, wt, bias)

    return out[:C, :OUT].astype(x.dtype)


if __name__ == "__main__":
    bits = 8
    # Small but non-trivial shapes: exercise K accumulation (3 k-steps), N tiling
    # (2 j-steps) and the pad/slice path (none of C/R/OUT is tile-aligned).
    C, R, OUT = 20, 300, 200

    key = jax.random.PRNGKey(0)
    k_w, k_b, k_x = jax.random.split(key, 3)

    W = jax.random.normal(k_w, (OUT, R), dtype=jnp.float32) * 0.1
    b = jax.random.normal(k_b, (OUT,), dtype=jnp.float32) * 0.1
    x = jax.random.normal(k_x, (C, R), dtype=jnp.float32)

    # One-time prep (equivalent of QLinear.__init__), hoisted off the hot path.
    # Small explicit tiles so these toy shapes still produce a multi-step grid.
    params = prepare_qlinear(W, b, bits=bits, tn=128, tk=128)

    fwd = jax.jit(functools.partial(qlinear_forward, params=params))
    out = jax.block_until_ready(fwd(x))

    # Reference: mirrors the PyTorch double loop (pure f32).
    weight_fixed = to_fix_point(W, bits).astype(jnp.float32)
    bias_fixed = to_fix_point(b, bits).astype(jnp.float32)
    ref = x @ weight_fixed.T / math.pow(2.0, bits - 1) + bias_fixed[None, :]

    assert out.shape == (C, OUT)
    assert out.dtype == x.dtype
    # bf16 activations on the MXU (weights/scale are exact in bf16), f32 accum.
    assert jnp.allclose(out, ref, atol=2e-2, rtol=2e-2), \
        float(jnp.max(jnp.abs(out - ref)))

    # Exact-semantics fallback path (f32 weights/activations) also compiles/runs.
    params_f32 = prepare_qlinear(W, b, bits=bits, compute_dtype=jnp.float32,
                                 tn=128, tk=128)
    out_f32 = jax.block_until_ready(qlinear_forward(x, params_f32))
    assert jnp.allclose(out_f32, ref, atol=2e-2, rtol=2e-2)

    print("KERNEL_OK")
</pallas_src>

<mosaic_0001>
module attributes {stable_mosaic.version = 11 : i64} {
  func.func @_qlinear_kernel(%arg0: i32, %arg1: i32, %arg2: i32, %arg3: memref<24x128xbf16, #tpu.memory_space<vmem>>, %arg4: memref<128x128xbf16, #tpu.memory_space<vmem>>, %arg5: memref<1x128xf32, #tpu.memory_space<vmem>>, %arg6: memref<24x128xf32, #tpu.memory_space<vmem>>, %arg7: memref<24x128xf32, #tpu.memory_space<vmem>>) attributes {dimension_semantics = [#tpu.dimension_semantics<parallel>, #tpu.dimension_semantics<parallel>, #tpu.dimension_semantics<arbitrary>], iteration_bounds = array<i64: 1, 2, 3>, scalar_prefetch = 0 : i64, scratch_operands = 1 : i64, tpu.core_type = #tpu.core_type<tc>, window_params = [{transform_indices = @transform_0, window_bounds = array<i64: 24, 128>}, {transform_indices = @transform_1, window_bounds = array<i64: 128, 128>}, {transform_indices = @transform_2, window_bounds = array<i64: 1, 128>}, {transform_indices = @transform_3, window_bounds = array<i64: 24, 128>}]} {
    %c0_i32 = arith.constant 0 : i32
    %0 = arith.cmpi eq, %arg2, %c0_i32 : i32
    %1 = arith.extui %0 : i1 to i32
    %c0_i32_0 = arith.constant 0 : i32
    %2 = arith.cmpi ne, %1, %c0_i32_0 : i32
    scf.if %2 {
      %cst_9 = arith.constant 0.000000e+00 : f32
      %12 = vector.broadcast %cst_9 : f32 to vector<24x128xf32>
      %c0_10 = arith.constant 0 : index
      %c0_11 = arith.constant 0 : index
      %13 = vector.load %arg7[%c0_10, %c0_11] : memref<24x128xf32, #tpu.memory_space<vmem>>, vector<24x128xf32>
      tpu.vector_store %arg7[%c0_10, %c0_11], %12 {strides = array<i32>} : memref<24x128xf32, #tpu.memory_space<vmem>>, vector<24x128xf32>,
    } else {
    }
    %c0 = arith.constant 0 : index
    %c0_1 = arith.constant 0 : index
    %3 = vector.load %arg7[%c0, %c0_1] : memref<24x128xf32, #tpu.memory_space<vmem>>, vector<24x128xf32>
    %c0_2 = arith.constant 0 : index
    %c0_3 = arith.constant 0 : index
    %4 = vector.load %arg3[%c0_2, %c0_3] : memref<24x128xbf16, #tpu.memory_space<vmem>>, vector<24x128xbf16>
    %c0_4 = arith.constant 0 : index
    %c0_5 = arith.constant 0 : index
    %5 = vector.load %arg4[%c0_4, %c0_5] : memref<128x128xbf16, #tpu.memory_space<vmem>>, vector<128x128xbf16>
    %cst = arith.constant dense<0.000000e+00> : vector<24x128xf32>
    %6 = tpu.matmul %4, %5, %cst {dimension_numbers = #tpu.dot_dimension_numbers<[1], [0], [0], [1], [0, 0, 1, 1], [], []>} : vector<24x128xbf16>, vector<128x128xbf16>, vector<24x128xf32> -> vector<24x128xf32>
    %7 = arith.addf %3, %6 : vector<24x128xf32>
    %c0_6 = arith.constant 0 : index
    %c0_7 = arith.constant 0 : index
    %8 = vector.load %arg7[%c0_6, %c0_7] : memref<24x128xf32, #tpu.memory_space<vmem>>, vector<24x128xf32>
    tpu.vector_store %arg7[%c0_6, %c0_7], %7 {strides = array<i32>} : memref<24x128xf32, #tpu.memory_space<vmem>>, vector<24x128xf32>,
    %c2_i32 = arith.constant 2 : i32
    %9 = arith.cmpi eq, %arg2, %c2_i32 : i32
    %10 = arith.extui %9 : i1 to i32
    %c0_i32_8 = arith.constant 0 : i32
    %11 = arith.cmpi ne, %10, %c0_i32_8 : i32
    scf.if %11 {
      %c0_9 = arith.constant 0 : index
      %c0_10 = arith.constant 0 : index
      %12 = vector.load %arg7[%c0_9, %c0_10] : memref<24x128xf32, #tpu.memory_space<vmem>>, vector<24x128xf32>
      %c0_11 = arith.constant 0 : index
      %c0_12 = arith.constant 0 : index
      %13 = vector.load %arg5[%c0_11, %c0_12] : memref<1x128xf32, #tpu.memory_space<vmem>>, vector<1x128xf32>
      %14 = vector.broadcast %13 : vector<1x128xf32> to vector<24x128xf32>
      %15 = arith.addf %12, %14 : vector<24x128xf32>
      %c0_13 = arith.constant 0 : index
      %c0_14 = arith.constant 0 : index
      %16 = vector.load %arg6[%c0_13, %c0_14] : memref<24x128xf32, #tpu.memory_space<vmem>>, vector<24x128xf32>
      tpu.vector_store %arg6[%c0_13, %c0_14], %15 {strides = array<i32>} : memref<24x128xf32, #tpu.memory_space<vmem>>, vector<24x128xf32>,
    } else {
    }
    return
  }
  func.func @transform_0(%arg0: i32, %arg1: i32, %arg2: i32) -> (i32, i32) {
    %c0_i32 = arith.constant 0 : i32
    return %arg0, %arg2 : i32, i32
  }
  func.func @transform_1(%arg0: i32, %arg1: i32, %arg2: i32) -> (i32, i32) {
    %c0_i32 = arith.constant 0 : i32
    return %arg2, %arg1 : i32, i32
  }
  func.func @transform_2(%arg0: i32, %arg1: i32, %arg2: i32) -> (i32, i32) {
    %c0_i32 = arith.constant 0 : i32
    %c0_i32_0 = arith.constant 0 : i32
    return %c0_i32, %arg1 : i32, i32
  }
  func.func @transform_3(%arg0: i32, %arg1: i32, %arg2: i32) -> (i32, i32) {
    %c0_i32 = arith.constant 0 : i32
    return %arg0, %arg1 : i32, i32
  }
}

</mosaic_0001>

<bundles_post_ra>
// kernel: qlinear_forward.1
= control target key start
LH: loop header
LB: loop body
LE: loop exit
PB: predicated region body
PF: predicated region fallthrough
CT: control target
= control target key end

     0   :  { %s1221_s0 = inlined_call_operand.vmem [shape: bf16[24,384], index: 0, kind: input, shape index: {}]   ;;  %s1222_s1 = inlined_call_operand.hbm [shape: bf16[384,256], index: 1, kind: input, shape index: {}]   ;;  %s1223_s2 = inlined_call_operand.vmem [shape: f32[1,256], index: 2, kind: input, shape index: {}]   ;;  %s1224_s3 = inlined_call_operand.hbm [shape: f32[24,256], index: 3, kind: output, shape index: {}]  }
   0x1   :  { %1230 = sst [smem:[#allocation18_spill]] %s1221_s0 }
   0x2   :  { %8 = vsyncpa [#allocation5], 0 }
   0x3   :  { %10 = vsyncpa [#allocation5 + $0x1], 0 }
   0x4   :  { %11 = vsyncpa [#allocation6], 0 }
   0x5   :  { %13 = vsyncpa [#allocation6 + $0x1], 0  ;;  %s964_s12 = smov 0   ;;  %s966_s13 = smov 0  }
   0x6   :  { %s968_s14 = smov 0   ;;  %s970_s15 = smov 0  }
   0x7   :  { %s972_s16 = smov 0   ;;  %s974_s17 = smov 0  }
   0x8   :  { %s976_s18 = smov 0   ;;  %s978_s19 = smov 0  }
   0x9   :  { %s980_s20 = smov 0   ;;  %s982_s21 = smov 0  }
   0xa   :  { %s984_s22 = smov 0   ;;  %s986_s23 = smov 0  }
   0xb   :  { %s988_s24 = smov 0  }
   0xc LB: > { %1231 = sst [smem:[#allocation10_spill]] %s895_s14  ;;  %s575_s25 = sadd.s32 4294967295, %s935_s24   ;;  %s935_s24 = sphi %s988_s24, %s19_s24   ;;  %s931_s23 = sphi %s986_s23, %s1264_s23   ;;  %s927_s22 = sphi %s984_s22, %s1263_s22   ;;  %s923_s21 = sphi %s982_s21, %s1262_s21   ;;  %s919_s20 = sphi %s980_s20, %s1261_s20   ;;  %s915_s19 = sphi %s978_s19, %s1252_s19   ;;  %s911_s18 = sphi %s976_s18, %s1251_s18   ;;  %s907_s17 = sphi %s974_s17, %s1260_s17   ;;  %s903_s16 = sphi %s972_s16, %s1259_s16   ;;  %s899_s15 = sphi %s970_s15, %s1258_s15   ;;  %s895_s14 = sphi %s968_s14, %s1249_s14   ;;  %s891_s13 = sphi %s966_s13, %s1257_s13   ;;  %s887_s12 = sphi %s964_s12, %s1256_s12  }
   0xd   : > { %1232 = sst [smem:[#allocation11_spill]] %s915_s19  ;;  %s31_s27 = sadd.s32 1, %s927_s22 }
   0xe   : > { %s34_s28 = sadd.s32 1, %s931_s23  ;;  %p32_p0 = scmp.ge.s32.totalorder %s31_s27, 3 }
   0xf   : > { %s47_s29 = sadd.s32 1, %s915_s19  ;;  %p54_p1 = scmp.ne.s32.totalorder %s915_s19, %s911_s18 }
  0x10   : > { %p55_p2 = scmp.eq.s32.totalorder %s935_s24, 0  ;;  %s1266_s27 = smov (%p32_p0, %s31_s27), 0 }
  0x11   : > { %1233 = sst [smem:[#allocation12_spill]] %s1266_s27  ;;  %s1268_s28 = smov (!%p32_p0, %s34_s28), %s931_s23 }
  0x12   : > { %s43_s30 = ssub.s32 %s927_s22, %s1266_s27  ;;  %p1042_p3 = por %p55_p2, %p54_p1 }
  0x13   : > { %p36_p4 = scmp.ge.s32.totalorder %s1268_s28, 2  ;;  %p45_p5 = scmp.eq.s32.totalorder %s43_s30, 0 }
  0x14   : > { %s75_s5 = sadd.s32 1, %s907_s17  ;;  %p82_p6 = scmp.ne.s32.totalorder %s907_s17, %s903_s16 }
  0x15   : > { %s1270_s28 = smov (%p36_p4, %s1268_s28), 0  ;;  %p88_p8 = scmp.ne.s32.totalorder %s903_s16, %s899_s15 }
  0x16   : > { %1235 = sst [smem:[#allocation13_spill]] %s1270_s28  ;;  %s71_s7 = ssub.s32 %s931_s23, %s1270_s28 }
  0x17   : > { %s1052_s6 = scalar_select %p45_p5, %s915_s19, %s47_s29  }
  0x18   : > { %p1056_p7 = por %p82_p6, %p55_p2  ;;  %s72_s9 = sor.u32 %s71_s7, %s43_s30 }
  0x19   : > { %1236 = sst [smem:[#allocation14_spill]] %s1052_s6  ;;  %p73_p9 = scmp.eq.s32.totalorder %s72_s9, 0 }
  0x1a   : > { %p89_p10 = scmp.eq.s32.totalorder %s575_s25, 0  ;;  %p127_p11 = scmp.eq.s32.totalorder %s71_s7, 0 }
  0x1b   : > { %s129_s10 = sadd.s32 1, %s895_s14  ;;  %p139_p13 = scmp.ne.s32.totalorder %s895_s14, %s891_s13 }
  0x1c   : > { %s1066_s11 = scalar_select %p73_p9, %s907_s17, %s75_s5  }
  0x1d   : > { %p1068_p12 = por %p89_p10, %p88_p8  ;;  %p140_p0 = scmp.eq.s32.totalorder %s575_s25, 5 }
  0x1e   : > { %1238 = sst [smem:[#allocation15_spill]] %s1066_s11  ;;  %p145_p1 = scmp.ne.s32.totalorder %s891_s13, %s887_s12 }
  0x1f   : > { %s1075_s29 = scalar_select %p127_p11, %s895_s14, %s129_s10  }
  0x20   : > { %s1241_s28 = sadd.s32 4294967294, %s935_s24   ;;  %p1083_p4 = por %p140_p0, %p139_p13 }
  0x21   : > { %1240 = sst [smem:[#allocation16_spill]] %s1075_s29  ;;  %p146_p2 = scmp.eq.s32.totalorder %s1241_s28, 5 }
  0x22   : > { %p578_p6 = scmp.ge.s32.totalorder %s935_s24, 6 }
  0x23   : > { %p1087_p5 = por %p146_p2, %p145_p1 }
  0x24   : > { %162 = sbr.rel (%p578_p6) target bundleno = 62 (0x3e), region = 16 }
  0x25   : > { %s1243_s30 = scalar_select %p1087_p5, 1, 0 }
  0x27   : > { %1244 = sst [smem:[#allocation17_spill]] %s1243_s30 }
  0x29   : > { %165 = sbr.rel (!%p1042_p3) target bundleno = 54 (0x36), region = 20  ;;  %s167_s25 = sand.u32 (%p1042_p3), 1, %s915_s19  }
  0x2a   : > { %s579_s5 = sshll.u32 (%p1042_p3), %s927_s22, 2  ;;  %s645_s7 = smul.u32 (%p1042_p3), 12, %s167_s25 }
  0x2b   : > { %s1245_s0 = sld [smem:[#allocation18_spill]] (%p1042_p3) }
  0x2c   : > { %s169_s27 = scalar_lea.vmem (%p1042_p3), [#allocation3], %s645_s7 }
  0x31   : > { %s174_s10 = scalar_lea.vmem %s1245_s0, %s579_s5 }
  0x32   : > { %v191_v0 = vld [vmem:[%s174_s10] sm:$0xf]  ;;  %v193_v1 = vld [vmem:[%s174_s10 + $0xc] sm:$0xf]  ;;  %v195_v2 = vld [vmem:[%s174_s10 + $0x18] sm:$0xf] }
  0x33   : > { %192 = vst [vmem:[%s169_s27] sm:$0xf] %v191_v0 }
  0x34   : > { %194 = vst [vmem:[%s169_s27 + $0x4] sm:$0xf] %v193_v1 }
  0x35   : > { %196 = vst [vmem:[%s169_s27 + $0x8] sm:$0xf] %v195_v2 }
  0x36 PF: > { %s227_s4 = sand.u32 1, %s907_s17   ;;  %s627_s6 = sshll.u32 %s927_s22, 5 }
  0x37   : > { %s580_s19 = sshll.u32 %s227_s4, 6  ;;  %s236_s25 = sadd.s32 %s931_s23, %s627_s6 }
  0x38   : > { %s583_s11 = sshll.u32 %s236_s25, 2  ;;  %s231_s29 = scalar_lea.vmem [#allocation4], %s580_s19 }
  0x39   : > { %s241_s28 = sshll.u32 %s231_s29, 4  ;;  %s238_s10 = scalar_lea.hbm %s1222_s1, %s583_s11  ;;  %s242_s28 = int_to_ptr.vmem [resolvable:$true] %s241_s28 }
  0x3a   : > { %s239_s7 = sshll.u32 %s238_s10, 4  ;;  %s228_s27 = scalar_lea.sflag [#allocation5], %s227_s4  ;;  %s240_s7 = int_to_ptr.hbm [resolvable:$true] %s239_s7 }
  0x3b   : > { %s937_s0 = smov 128   ;;  %s938_s14 = smov 64  }
  0x3c   : > { %s939_s30 = smov 4  }
  0x3d   : > { %648 = dma.hbm_to_vmem [thread:$0]  (%p1056_p7), %s240_s7, 1024, %s242_s28, %s228_s27, %s937_s0, %s938_s14, %s939_s30  }
  0x3e PF: > { %p584_p3 = scmp.ge.s32.totalorder %s935_s24, 1  ;;  %p255_p8 = scmp.lt.s32.totalorder %s935_s24, 7 }
  0x40   : > { %p256_p9 = pnand %p584_p3, %p255_p8 }
  0x41   : > { %s262_s19 = sand.u32 (!%p256_p9), 1, %s911_s18   ;;  %s268_s6 = sand.u32 (!%p256_p9), 1, %s903_s16  }
  0x42   : > { %259 = sbr.rel (%p256_p9) target bundleno = 280 (0x118), region = 69  ;;  %s585_s29 = sshll.u32 (!%p256_p9), %s268_s6, 6 }
  0x43   : > { %s1111_s11 = smul.u32 (!%p256_p9), 12, %s262_s19  ;;  %s269_s25 = scalar_lea.sflag (!%p256_p9), [#allocation5], %s268_s6 }
  0x44   : > { %s1114_s8 = scalar_lea.vmem (!%p256_p9), [#allocation4], %s585_s29 }
  0x45   : > { %s264_s4 = scalar_lea.vmem (!%p256_p9), [#allocation3], %s1111_s11 }
  0x47   : > { %878 = dma.done.wait (%p1068_p12), %s269_s25, 1024  }
  0x48   : > { %880 = vsyncadd (%p1068_p12), %s269_s25, 4294966272  ;;  %s300_s0 = sand.u32 1, %s891_s13   ;;  %p305_p7 = scmp.lt.s32.totalorder %s923_s21, 1 }
  0x49   : > { %s647_s14 = smul.u32 24, %s300_s0  ;;  %p586_p10 = scmp.ne.s32.totalorder %s919_s20, 0 }
  0x4a   : > { %s1125_s18 = scalar_select %p305_p7, %s923_s21, 1 }
  0x4b   : > { %s1131_s9 = scalar_lea.vmem [#allocation7], %s647_s14  ;;  %312 = sbr.rel (%p586_p10) target bundleno = 84 (0x54), region = 81 }
  0x4c   : > { %s307_s5 = scalar_lea.vmem %s1223_s2, %s1125_s18 }
  0x50   : > { %v940_v3 = vmov 0.0  }
  0x51   : > { %313 = vst [vmem:[#allocation2 + $0x10] sm:$0xff] %v940_v3 }
  0x52   : > { %314 = vst [vmem:[#allocation2] sm:$0xff] %v940_v3 }
  0x53   : > { %315 = vst [vmem:[#allocation2 + $0x8] sm:$0xff] %v940_v3 }
  0x54 PF: > { %v636_v4 = vld [vmem:[%s1114_s8 + $0x38] sm:$0xff]  ;;  %v635_v5 = vld [vmem:[%s1114_s8 + $0x30] sm:$0xff]  ;;  %v634_v6 = vld [vmem:[%s1114_s8 + $0x28] sm:$0xff]  ;;  %p623_p11 = scmp.ne.s32.totalorder %s919_s20, 2 }
  0x55   : > { %396 = vmatpush.bf16.msra.mxu0 %v636_v4  ;;  %637 = vmatpush.bf16.msra.mxu1 %v636_v4  ;;  %v633_v7 = vld [vmem:[%s1114_s8 + $0x20] sm:$0xff]  ;;  %v632_v8 = vld [vmem:[%s1114_s8 + $0x18] sm:$0xff]  ;;  %v631_v9 = vld [vmem:[%s1114_s8 + $0x10] sm:$0xff] }
  0x56   : > { %v630_v10 = vld [vmem:[%s1114_s8 + $0x8] sm:$0xff]  ;;  %v321_v11 = vld [vmem:[%s264_s4 + $0x8] sm:$0xf]  ;;  %v629_v13 = vld [vmem:[%s1114_s8] sm:$0xff] }
  0x57   : > { %v343_v12 = vunpack.c.l.b16 %v321_v11  ;;  %v628_v14 = vld [vmem:[%s264_s4] sm:$0xff] }
  0x58   : > { %v316_v16 = vld [vmem:[#allocation2 + $0x10] sm:$0xff] }
  0x59   : > { %397 = vmatpush.bf16.msra.mxu0 %v635_v5  ;;  %638 = vmatpush.bf16.msra.mxu1 %v635_v5  ;;  %v345_v15 = vpack.c.b16 %v343_v12, %v343_v12  ;;  %v317_v22 = vld [vmem:[#allocation2] sm:$0xff] }
  0x5a   : > { %v318_v17 = vld [vmem:[#allocation2 + $0x8] sm:$0xff] }
  0x5d   : > { %398 = vmatpush.bf16.msra.mxu0 %v634_v6  ;;  %639 = vmatpush.bf16.msra.mxu1 %v634_v6 }
  0x61   : > { %399 = vmatpush.bf16.msra.mxu0 %v633_v7  ;;  %640 = vmatpush.bf16.msra.mxu1 %v633_v7 }
  0x65   : > { %400 = vmatpush.bf16.msra.mxu0 %v632_v8  ;;  %641 = vmatpush.bf16.msra.mxu1 %v632_v8 }
  0x69   : > { %401 = vmatpush.bf16.msra.mxu0 %v631_v9  ;;  %642 = vmatpush.bf16.msra.mxu1 %v631_v9 }
  0x6d   : > { %402 = vmatpush.bf16.msra.mxu0 %v630_v10  ;;  %643 = vmatpush.bf16.msra.mxu1 %v630_v10 }
  0x71   : > { %403 = vmatpush.bf16.msra.mxu0 %v629_v13  ;;  %644 = vmatpush.bf16.msra.mxu1 %v629_v13 }
  0x74   : > { %404 = vmatmul.bf16.vlgmr.msra.gmra.mxu0 %v628_v14  ;;  %409 = vmatmul.bf16.vlgmr.msra.gmra.mxu1 %v345_v15 }
  0xf1   : > { %v405_v18 = vpop.f32.mrf.mxu0  ;;  %v410_v19 = vpop.f32.mrf.mxu1 }
  0xf2   : > { %v414_v20 = vadd.f32 %v405_v18, %v316_v16  ;;  %v416_v21 = vadd.f32 %v410_v19, %v318_v17 }
  0xf4   : > { %417 = vst [vmem:[#allocation2 + $0x10] sm:$0xff] %v414_v20 }
  0xf5   : > { %419 = vst [vmem:[#allocation2 + $0x8] sm:$0xff] %v416_v21 }
  0xf8   : > { %423 = sbr.rel (%p623_p11) target bundleno = 263 (0x107), region = 85 }
  0xf9   : > { %v407_v23 = vpop.f32.mrf.mxu0  ;;  %v412_v24 = vpop.f32.mrf.mxu1 }
  0xfa   : > { %v415_v25 = vadd.f32 %v407_v23, %v317_v22 }
  0xfc   : > { %418 = vst [vmem:[#allocation2] sm:$0xff] %v415_v25 }
  0xfd   : > { %v424_v26 = vld [vmem:[#allocation2 + $0x10] sm:$0xff]  ;;  %v768_v27 = vld [vmem:[%s307_s5] ss:$0 sm:$0xff]  ;;  %v426_v29 = vld [vmem:[#allocation2 + $0x8] sm:$0xff] }
  0xfe   : > { %v431_v30 = vadd.f32 %v768_v27, %v424_v26  ;;  %v433_v32 = vadd.f32 %v768_v27, %v426_v29 }
 0x100   : > { %434 = vst [vmem:[%s1131_s9] sm:$0xff] %v431_v30 }
 0x101   : > { %436 = vst [vmem:[%s1131_s9 + $0x10] sm:$0xff] %v433_v32 }
 0x103   : > { %v425_v28 = vld [vmem:[#allocation2] sm:$0xff] }
 0x104   : > { %v432_v31 = vadd.f32 %v768_v27, %v425_v28 }
 0x106   : > { %435 = vst [vmem:[%s1131_s9 + $0x8] sm:$0xff] %v432_v31 }
 0x107 PF: > { %s624_s20 = sshll.u32 %s923_s21, 3  ;;  %s452_s6 = sshll.u32 %s1131_s9, 4  ;;  %s453_s6 = int_to_ptr.vmem [resolvable:$true] %s452_s6 }
 0x108   : > { %s451_s19 = scalar_lea.hbm %s1224_s3, %s624_s20  ;;  %s438_s29 = scalar_lea.sflag [#allocation6], %s300_s0 }
 0x109   : > { %s454_s11 = sshll.u32 %s451_s19, 4  ;;  %s817_s21 = scalar_lea.hbm %s1224_s3, 48  ;;  %s455_s11 = int_to_ptr.hbm [resolvable:$true] %s454_s11 }
 0x10a   : > { %s811_s4 = sshra.s32 %s455_s11, 4  ;;  %s812_s4 = int_to_ptr.hbm [resolvable:$true] %s811_s4 }
 0x10b   : > { %s813_s25 = scalar_lea.hbm %s812_s4, 24  ;;  %p818_p1 = scmp.lt.s32.totalorder %s812_s4, %s1224_s3 }
 0x10c   : > { %p814_p12 = scmp.ne.s32.totalorder %s812_s4, %s813_s25  ;;  %p819_p2 = scmp.lt.s32.totalorder %s817_s21, %s813_s25 }
 0x10e   : > { %p815_p13 = pnand %p814_p12, %p1083_p4  ;;  %p820_p6 = por %p819_p2, %p818_p1 }
 0x110   : > { %p816_p0 = pneg %p815_p13 }
 0x112   : > { %p821_p3 = pnand %p820_p6, %p816_p0 }
 0x114   : > { %824 = shalt.err (!%p821_p3)
}
 0x115   : > { %s941_s0 = smov 128   ;;  %s942_s28 = smov 256  }
 0x116   : > { %s943_s5 = smov 8  }
 0x117   : > { %650 = dma.vmem_to_hbm [thread:$0]  (%p1083_p4), %s453_s6, 384, %s455_s11, %s438_s29, %s941_s0, %s942_s28, %s943_s5  }
 0x118 PF: > { %p656_p8 = scmp.ge.s32.totalorder %s935_s24, 2  ;;  %s469_s26 = sand.u32 1, %s887_s12  }
 0x119   : > { %s470_s10 = scalar_lea.sflag [#allocation6], %s469_s26 }
 0x11a   : > { %p653_p9 = pnand %p656_p8, %p1087_p5 }
 0x11c   : > { %p654_p7 = pneg %p653_p9 }
 0x11e   : > { %882 = dma.done.wait (%p654_p7), %s470_s10, 384  }
 0x11f   : > { %884 = vsyncadd (%p654_p7), %s470_s10, 4294966912  ;;  %s19_s24 = sadd.s32 1, %s935_s24   ;;  %s1248_s15 = sld [smem:[#allocation10_spill]] }
 0x120   : > { %p1177_p10 = scmp.ge.s32.totalorder %s19_s24, 8   ;;  %s1249_s14 = sld [smem:[#allocation16_spill]] }
 0x121   : > { %s1250_s7 = sld [smem:[#allocation15_spill]]  ;;  %s1256_s12 = smov %s891_s13 }
 0x122   : > { %s1251_s18 = sld [smem:[#allocation11_spill]]  ;;  %s1261_s20 = smov %s927_s22 }
 0x123   : > { %s1252_s19 = sld [smem:[#allocation14_spill]]  ;;  %s1262_s21 = smov %s931_s23 }
 0x124   : > { %s1253_s27 = sld [smem:[#allocation12_spill]] }
 0x125   : > { %s1254_s6 = sld [smem:[#allocation13_spill]]  ;;  %s1257_s13 = smov %s1248_s15 }
 0x126   : > { %s1258_s15 = smov %s903_s16  ;;  %s1259_s16 = smov %s907_s17 }
 0x127   : > { %s1260_s17 = smov %s1250_s7  ;;  %18 = sbr.rel (!%p1177_p10) target bundleno = 12 (0xc), region = 137 }
 0x12a   : > { %s1263_s22 = smov %s1253_s27 }
 0x12b   : > { %s1264_s23 = smov %s1254_s6 }
 0x12c   :  { %476 = vsyncpa [#allocation5], 1 }
 0x12d   :  { %478 = vsyncpa [#allocation5 + $0x1], 1 }
 0x12e   :  { %479 = vsyncpa [#allocation6], 1 }
 0x12f   :  { %481 = vsyncpa [#allocation6 + $0x1], 1 }

</bundles_post_ra>
